<compile_context>
chip_gen: v7x
topology: tpu7x:2x2x1
jax: 0.10.0
libtpu: 0.0.40
codegen_flags: <defaults>
</compile_context>

<pallas_src>
import functools

import numpy as np
import jax
import jax.numpy as jnp
from jax.experimental import pallas as pl
from jax.experimental.pallas import tpu as pltpu


def _round_up(x, m):
    return ((x + m - 1) // m) * m


def _linear_spec_kernel(frames_ref, csT_ref, filtT_ref, out_ref):
    # frames_ref: (1, n_fft, tT)  -- un-windowed frames, frame index on the lane axis
    # csT_ref:    (2*nbin, n_fft) -- [win*cos ; -win*sin] DFT matrix, transposed
    # filtT_ref:  (nCh, 2*nbin)   -- 0/1 linear filterbank, doubled for re|im, transposed
    # out_ref:    (1, nCh, tT)
    f = frames_ref[0]                                                     # (n_fft, tT)
    s = jnp.dot(csT_ref[...], f, preferred_element_type=jnp.float32)      # MXU, (2*nbin, tT)
    power = s * s                                                         # |STFT|^2 (power=2), f32
    out_ref[0] = jnp.dot(filtT_ref[...], power,
                         preferred_element_type=jnp.float32)              # (nCh, tT)


def make_dft_weights(n_fft, nCh):
    """Window-folded fused DFT matrix (transposed) + doubled linear filterbank (transposed)."""
    nbin = n_fft // 2
    assert nbin % nCh == 0, "nbin must be a multiple of nCh"
    n = np.arange(n_fft, dtype=np.float64)
    # torch.hamming_window defaults: periodic=True, alpha=0.54, beta=0.46
    win = 0.54 - 0.46 * np.cos(2.0 * np.pi * n / n_fft)
    k = np.arange(1, nbin + 1, dtype=np.float64)[None, :]   # DC bin dropped (specData[:, 1:, :])
    ang = 2.0 * np.pi * n[:, None] * k / n_fft
    cs = np.concatenate([np.cos(ang) * win[:, None],
                         -np.sin(ang) * win[:, None]], axis=1)            # (n_fft, 2*nbin)
    csT = np.ascontiguousarray(cs.T).astype(np.float32)                   # (2*nbin, n_fft)
    fbin = nbin // nCh
    filt = np.zeros((nbin, nCh), dtype=np.float32)
    for ch in range(nCh):
        filt[ch * fbin:(ch + 1) * fbin, ch] = 1.0
    filt2T = np.ascontiguousarray(np.concatenate([filt, filt], axis=0).T)  # (nCh, 2*nbin)
    return jnp.asarray(csT), jnp.asarray(filt2T)


def frame_signal_T(wav, n_fft, hop_length, T_pad):
    """Frames in transposed (B, n_fft, T_pad) layout via strided reshape/concat (no gather)."""
    B, L = wav.shape
    assert n_fft % hop_length == 0, "hop_length must divide n_fft for strided framing"
    pad = n_fft // 2
    assert L > pad, "reflect padding requires L > n_fft // 2"
    # torchaudio Spectrogram defaults: center=True, pad_mode='reflect', win_length=n_fft
    padded = jnp.pad(wav, ((0, 0), (pad, pad)), mode="reflect")
    r = n_fft // hop_length
    n_chunks = T_pad + r - 1
    need = n_chunks * hop_length
    cur = padded.shape[1]
    if cur < need:   # zero-pad -> extra frames are all-zero and get sliced off after the kernel
        padded = jnp.pad(padded, ((0, 0), (0, need - cur)))
    elif cur > need:
        padded = padded[:, :need]
    # chunksT[b, j, c] = padded[b, c*hop + j]
    chunksT = padded.reshape(B, n_chunks, hop_length).transpose(0, 2, 1)   # (B, hop, n_chunks)
    # frames_T[b, o*hop + j, t] = chunksT[b, j, t + o] = padded[b, t*hop + (o*hop + j)]
    frames_T = jnp.concatenate([chunksT[:, :, o:o + T_pad] for o in range(r)], axis=1)
    return frames_T                                                        # (B, n_fft, T_pad)


@functools.partial(jax.jit,
                   static_argnames=("nCh", "n_fft", "hop_length", "tile_t", "compute_dtype"))
def linear_spectrogram(wav, *, nCh=128, n_fft=2048, hop_length=256,
                       tile_t=512, compute_dtype=jnp.bfloat16):
    """Equivalent of LinearSpectrogram.forward: (B, L) audio -> (B, nCh, 1 + L//hop)."""
    B, L = wav.shape
    nbin = n_fft // 2
    T = 1 + L // hop_length                          # center=True frame count
    # lane-friendly frame tile: multiple of 128, capped at tile_t; pad T so blocks divide evenly
    tT = min(tile_t, _round_up(T, 128))
    T_pad = _round_up(T, tT)

    frames_T = frame_signal_T(wav, n_fft, hop_length, T_pad).astype(compute_dtype)
    csT, filt2T = make_dft_weights(n_fft, nCh)
    csT = csT.astype(compute_dtype)

    out = pl.pallas_call(
        _linear_spec_kernel,
        out_shape=jax.ShapeDtypeStruct((B, nCh, T_pad), jnp.float32),
        grid_spec=pltpu.PrefetchScalarGridSpec(
            num_scalar_prefetch=0,
            grid=(B, T_pad // tT),
            in_specs=[
                pl.BlockSpec((1, n_fft, tT), lambda b, t: (b, 0, t)),
                # constant block index -> fetched once, not re-DMA'd every grid step
                pl.BlockSpec((2 * nbin, n_fft), lambda b, t: (0, 0)),
                pl.BlockSpec((nCh, 2 * nbin), lambda b, t: (0, 0)),
            ],
            out_specs=pl.BlockSpec((1, nCh, tT), lambda b, t: (b, 0, t)),
        ),
        compiler_params=pltpu.CompilerParams(
            dimension_semantics=("parallel", "parallel")),
    )(frames_T, csT, filt2T)

    # Output is already (B, nCh, T) -- the module's final permute(0, 2, 1) is fused away.
    return out[:, :, :T]


def _reference_independent(wav, *, nCh, n_fft, hop_length):
    """Pure-JAX f32 reference mirroring the PyTorch module step-by-step
    (gather framing, explicit window, separate cos/sin DFT matmuls)."""
    B, L = wav.shape
    pad = n_fft // 2
    padded = jnp.pad(wav, ((0, 0), (pad, pad)), mode="reflect")
    T = 1 + L // hop_length
    idx = np.arange(T)[:, None] * hop_length + np.arange(n_fft)[None, :]
    frames = padded[:, idx].astype(jnp.float32)                            # (B, T, n_fft)
    n = np.arange(n_fft, dtype=np.float64)
    win = jnp.asarray((0.54 - 0.46 * np.cos(2.0 * np.pi * n / n_fft)).astype(np.float32))
    f = frames * win[None, None, :]
    nbin = n_fft // 2
    k = np.arange(1, nbin + 1, dtype=np.float64)[None, :]
    ang = 2.0 * np.pi * n[:, None] * k / n_fft
    cos_m = jnp.asarray(np.cos(ang).astype(np.float32))
    sin_m = jnp.asarray((-np.sin(ang)).astype(np.float32))
    re = jnp.einsum("btn,nk->btk", f, cos_m)
    im = jnp.einsum("btn,nk->btk", f, sin_m)
    power = re * re + im * im
    fbin = nbin // nCh
    filt = np.zeros((nbin, nCh), dtype=np.float32)
    for ch in range(nCh):
        filt[ch * fbin:(ch + 1) * fbin, ch] = 1.0
    out = jnp.einsum("btk,kc->btc", power, jnp.asarray(filt))
    return jnp.transpose(out, (0, 2, 1))                                   # (B, nCh, T)


def _reference_matched(wav, *, nCh, n_fft, hop_length, compute_dtype):
    """Reference with the same quantization as the kernel (window-folded fused DFT matrix
    cast to compute_dtype) but untiled gather framing, batch einsums and the original
    (B, T, nCh)->permute ordering -- checks the Pallas tiling / transposed-layout plumbing."""
    pad = n_fft // 2
    padded = jnp.pad(wav, ((0, 0), (pad, pad)), mode="reflect")
    T = 1 + wav.shape[1] // hop_length
    idx = np.arange(T)[:, None] * hop_length + np.arange(n_fft)[None, :]
    frames = padded[:, idx].astype(compute_dtype)                          # (B, T, n_fft)
    csT, filt2T = make_dft_weights(n_fft, nCh)
    s = jnp.einsum("btn,kn->btk", frames, csT.astype(compute_dtype),
                   preferred_element_type=jnp.float32)
    out = jnp.einsum("btk,ck->btc", s * s, filt2T)
    return jnp.transpose(out, (0, 2, 1))                                   # (B, nCh, T)


if __name__ == "__main__":
    # small shapes consistent with the module: nCh=16, n_fft=128, hop_length=32 -> nbin=64
    B, L = 2, 1024
    nCh, n_fft, hop = 16, 128, 32
    key = jax.random.PRNGKey(0)
    wav = jax.random.normal(key, (B, L), dtype=jnp.float32)
    T = 1 + L // hop

    ref_f32 = _reference_independent(wav, nCh=nCh, n_fft=n_fft, hop_length=hop)

    # f32 path: tight check against the independent step-by-step reference.
    out_f32 = jax.block_until_ready(
        linear_spectrogram(wav, nCh=nCh, n_fft=n_fft, hop_length=hop,
                           compute_dtype=jnp.float32))
    assert out_f32.shape == (B, nCh, T), out_f32.shape
    np.testing.assert_allclose(np.asarray(out_f32), np.asarray(ref_f32),
                               rtol=2e-3, atol=2e-3)

    # bf16 DFT-matmul path (v6e/v7x feedback): tight check vs a reference applying the same
    # quantization, plus a loose semantic check vs the pure-f32 reference.
    out_bf16 = jax.block_until_ready(
        linear_spectrogram(wav, nCh=nCh, n_fft=n_fft, hop_length=hop,
                           compute_dtype=jnp.bfloat16))
    ref_bf16 = _reference_matched(wav, nCh=nCh, n_fft=n_fft, hop_length=hop,
                                  compute_dtype=jnp.bfloat16)
    assert out_bf16.shape == (B, nCh, T), out_bf16.shape
    np.testing.assert_allclose(np.asarray(out_bf16), np.asarray(ref_bf16),
                               rtol=1e-3, atol=1e-3)
    np.testing.assert_allclose(np.asarray(out_bf16), np.asarray(ref_f32),
                               rtol=1e-1, atol=2.0)
    print("KERNEL_OK")
</pallas_src>

<mosaic_0001>
module attributes {stable_mosaic.version = 11 : i64} {
  func.func @_linear_spec_kernel(%arg0: i32, %arg1: i32, %arg2: memref<1x128x128xf32, #tpu.memory_space<vmem>>, %arg3: memref<128x128xf32, #tpu.memory_space<vmem>>, %arg4: memref<16x128xf32, #tpu.memory_space<vmem>>, %arg5: memref<1x16x128xf32, #tpu.memory_space<vmem>>) attributes {dimension_semantics = [#tpu.dimension_semantics<parallel>, #tpu.dimension_semantics<parallel>], iteration_bounds = array<i64: 2, 1>, scalar_prefetch = 0 : i64, scratch_operands = 0 : i64, tpu.core_type = #tpu.core_type<tc>, window_params = [{transform_indices = @transform_0, window_bounds = array<i64: 1, 128, 128>}, {pipeline_mode = #tpu.pipeline_mode<synchronous>, transform_indices = @transform_1, window_bounds = array<i64: 128, 128>}, {pipeline_mode = #tpu.pipeline_mode<synchronous>, transform_indices = @transform_2, window_bounds = array<i64: 16, 128>}, {transform_indices = @transform_3, window_bounds = array<i64: 1, 16, 128>}]} {
    %c0 = arith.constant 0 : index
    %c0_0 = arith.constant 0 : index
    %c0_1 = arith.constant 0 : index
    %0 = vector.load %arg2[%c0, %c0_0, %c0_1] : memref<1x128x128xf32, #tpu.memory_space<vmem>>, vector<1x128x128xf32>
    %1 = vector.shape_cast %0 : vector<1x128x128xf32> to vector<128x128xf32>
    %c0_2 = arith.constant 0 : index
    %c0_3 = arith.constant 0 : index
    %2 = vector.load %arg3[%c0_2, %c0_3] : memref<128x128xf32, #tpu.memory_space<vmem>>, vector<128x128xf32>
    %cst = arith.constant dense<0.000000e+00> : vector<128x128xf32>
    %3 = tpu.matmul %2, %1, %cst {dimension_numbers = #tpu.dot_dimension_numbers<[1], [0], [0], [1], [0, 0, 1, 1], [], []>} : vector<128x128xf32>, vector<128x128xf32>, vector<128x128xf32> -> vector<128x128xf32>
    %4 = arith.mulf %3, %3 : vector<128x128xf32>
    %c0_4 = arith.constant 0 : index
    %c0_5 = arith.constant 0 : index
    %5 = vector.load %arg4[%c0_4, %c0_5] : memref<16x128xf32, #tpu.memory_space<vmem>>, vector<16x128xf32>
    %cst_6 = arith.constant dense<0.000000e+00> : vector<16x128xf32>
    %6 = tpu.matmul %5, %4, %cst_6 {dimension_numbers = #tpu.dot_dimension_numbers<[1], [0], [0], [1], [0, 0, 1, 1], [], []>} : vector<16x128xf32>, vector<128x128xf32>, vector<16x128xf32> -> vector<16x128xf32>
    %c0_7 = arith.constant 0 : index
    %c0_8 = arith.constant 0 : index
    %c0_9 = arith.constant 0 : index
    %7 = vector.load %arg5[%c0_7, %c0_8, %c0_9] : memref<1x16x128xf32, #tpu.memory_space<vmem>>, vector<1x16x128xf32>
    %8 = vector.shape_cast %7 : vector<1x16x128xf32> to vector<16x128xf32>
    %9 = vector.shape_cast %6 : vector<16x128xf32> to vector<1x16x128xf32>
    tpu.vector_store %arg5[%c0_7, %c0_8, %c0_9], %9 {strides = array<i32>} : memref<1x16x128xf32, #tpu.memory_space<vmem>>, vector<1x16x128xf32>,
    return
  }
  func.func @transform_0(%arg0: i32, %arg1: i32) -> (i32, i32, i32) {
    %c0_i32 = arith.constant 0 : i32
    %c0_i32_0 = arith.constant 0 : i32
    return %arg0, %c0_i32, %arg1 : i32, i32, i32
  }
  func.func @transform_1(%arg0: i32, %arg1: i32) -> (i32, i32) {
    %c0_i32 = arith.constant 0 : i32
    %c0_i32_0 = arith.constant 0 : i32
    %c0_i32_1 = arith.constant 0 : i32
    return %c0_i32, %c0_i32_0 : i32, i32
  }
  func.func @transform_2(%arg0: i32, %arg1: i32) -> (i32, i32) {
    %c0_i32 = arith.constant 0 : i32
    %c0_i32_0 = arith.constant 0 : i32
    %c0_i32_1 = arith.constant 0 : i32
    return %c0_i32, %c0_i32_0 : i32, i32
  }
  func.func @transform_3(%arg0: i32, %arg1: i32) -> (i32, i32, i32) {
    %c0_i32 = arith.constant 0 : i32
    %c0_i32_0 = arith.constant 0 : i32
    return %arg0, %c0_i32, %arg1 : i32, i32, i32
  }
}

</mosaic_0001>

<bundles_post_ra>
// kernel: linear_spectrogram.1
= control target key start
LH: loop header
LB: loop body
LE: loop exit
PB: predicated region body
PF: predicated region fallthrough
CT: control target
= control target key end

     0   :  { %8 = vsyncpa [#allocation3], 0  ;;  %s1126_s0 = inlined_call_operand.vmem [shape: f32[2,128,128], index: 0, kind: input, shape index: {}]   ;;  %s1127_s1 = inlined_call_operand.vmem [shape: f32[128,128], index: 1, kind: input, shape index: {}]   ;;  %s1128_s2 = inlined_call_operand.vmem [shape: f32[16,128], index: 2, kind: input, shape index: {}]   ;;  %s1129_s3 = inlined_call_operand.hbm [shape: f32[2,16,128], index: 3, kind: output, shape index: {}]  }
   0x1   :  { %10 = vsyncpa [#allocation3 + $0x1], 0  ;;  %s939_s12 = smov 0   ;;  %s941_s13 = smov 0  }
   0x2   :  { %s943_s14 = smov 0   ;;  %s945_s15 = smov 0  }
   0x3   :  { %s947_s16 = smov 0   ;;  %s949_s17 = smov 0  }
   0x4 LB: > { %s559_s18 = sadd.s32 4294967295, %s914_s17   ;;  %s560_s19 = sadd.s32 4294967294, %s914_s17   ;;  %s914_s17 = sphi %s949_s17, %s16_s17   ;;  %s910_s16 = sphi %s947_s16, %s1136_s16   ;;  %s906_s15 = sphi %s945_s15, %s1135_s15   ;;  %s902_s14 = sphi %s943_s14, %s1134_s14   ;;  %s898_s13 = sphi %s941_s13, %s1133_s13   ;;  %s894_s12 = sphi %s939_s12, %s1132_s12  }
   0x5   : > { %s28_s20 = sadd.s32 1, %s910_s16  ;;  %s107_s21 = sadd.s32 1, %s902_s14 }
   0x6   : > { %p30_p0 = scmp.ge.s32.totalorder %s28_s20, 2  ;;  %p117_p1 = scmp.ne.s32.totalorder %s902_s14, %s898_s13 }
   0x7   : > { %p118_p2 = scmp.eq.s32.totalorder %s559_s18, 1  ;;  %p123_p3 = scmp.ne.s32.totalorder %s898_s13, %s894_s12 }
   0x8   : > { %s1138_s20 = smov (%p30_p0, %s28_s20), 0  ;;  %p124_p5 = scmp.eq.s32.totalorder %s560_s19, 1 }
   0x9   : > { %p979_p4 = por %p118_p2, %p117_p1  ;;  %s102_s23 = ssub.s32 %s910_s16, %s1138_s20 }
   0xa   : > { %p563_p6 = scmp.ge.s32.totalorder %s914_s17, 1  ;;  %p105_p7 = scmp.eq.s32.totalorder %s102_s23, 0 }
   0xb   : > { %p986_p8 = por %p124_p5, %p123_p3  ;;  %p159_p9 = scmp.lt.s32.totalorder %s914_s17, 3 }
   0xc   : > { %s992_s25 = scalar_select %p105_p7, %s902_s14, %s107_s21  }
   0xd   : > { %p160_p10 = pnand %p563_p6, %p159_p9 }
   0xe   : > { %p186_p11 = scmp.lt.s32.totalorder (!%p160_p10), %s906_s15, 1  ;;  %v210_v0 = vld [vmem:[%s1127_s1] sm:$0xff] (!%p160_p10)  ;;  %v211_v25 = vld [vmem:[%s1127_s1 + $0x8] sm:$0xff] (!%p160_p10)  ;;  %v212_v26 = vld [vmem:[%s1127_s1 + $0x10] sm:$0xff] (!%p160_p10)  ;;  %s183_s6 = sand.u32 (!%p160_p10), 1, %s898_s13  }
   0xf   : > { %163 = sbr.rel (%p160_p10) target bundleno = 538 (0x21a), region = 32  ;;  %656 = vmatprep.mubr.f32.mxu0 (!%p160_p10), %v210_v0  ;;  %v213_v27 = vld [vmem:[%s1127_s1 + $0x18] sm:$0xff] (!%p160_p10)  ;;  %v214_v28 = vld [vmem:[%s1127_s1 + $0x20] sm:$0xff] (!%p160_p10)  ;;  %v215_v29 = vld [vmem:[%s1127_s1 + $0x28] sm:$0xff] (!%p160_p10)  ;;  %s564_s7 = sshll.u32 (!%p160_p10), %s183_s6, 4 }
  0x10   : > { %v216_v30 = vld [vmem:[%s1127_s1 + $0x30] sm:$0xff] (!%p160_p10)  ;;  %v217_v31 = vld [vmem:[%s1127_s1 + $0x38] sm:$0xff] (!%p160_p10)  ;;  %v218_v32 = vld [vmem:[%s1127_s1 + $0x40] sm:$0xff] (!%p160_p10)  ;;  %s185_s8 = scalar_lea.vmem (!%p160_p10), [#allocation2], %s564_s7  ;;  %s573_s10 = sshll.u32 (!%p160_p10), %s906_s15, 8 }
  0x11   : > { %v219_v33 = vld [vmem:[%s1127_s1 + $0x48] sm:$0xff] (!%p160_p10)  ;;  %v220_v34 = vld [vmem:[%s1127_s1 + $0x50] sm:$0xff] (!%p160_p10)  ;;  %v221_v35 = vld [vmem:[%s1127_s1 + $0x58] sm:$0xff] (!%p160_p10)  ;;  %s481_s9 = sshll.u32 (!%p160_p10), %s185_s8, 4  ;;  %s1078_s19 = scalar_lea.hbm (!%p160_p10), %s1129_s3, %s573_s10  ;;  %s1073_s9 = int_to_ptr.vmem [resolvable:$true] %s481_s9 }
  0x12   : > { %v222_v36 = vld [vmem:[%s1127_s1 + $0x60] sm:$0xff] (!%p160_p10)  ;;  %v223_v37 = vld [vmem:[%s1127_s1 + $0x68] sm:$0xff] (!%p160_p10)  ;;  %v224_v38 = vld [vmem:[%s1127_s1 + $0x70] sm:$0xff] (!%p160_p10)  ;;  %s1080_s21 = scalar_lea.sflag (!%p160_p10), [#allocation3], %s183_s6  ;;  %s836_s23 = scalar_lea.vmem (!%p160_p10), %s1073_s9, 256 }
  0x13   : > { %v225_v39 = vld [vmem:[%s1127_s1 + $0x78] sm:$0xff] (!%p160_p10)  ;;  %v387_v40 = vld [vmem:[%s1128_s2] sm:$0xff] (!%p160_p10)  ;;  %p837_p12 = scmp.ne.s32.totalorder (!%p160_p10), %s1073_s9, %s836_s23 }
  0x14   : > { %712 = vmatprep.mubr.f32.mxu1 (!%p160_p10), %v387_v40 }
  0x15   : > { %p838_p13 = pnand (!%p160_p10), %p837_p12, %p979_p4 }
  0x16   : > { %s187_s28 = scalar_select %p186_p11, %s906_s15, 1 }
  0x17   : > { %p839_p0 = pneg %p838_p13  ;;  %s916_s15 = smov [#allocation2]  }
  0x18   : > { %s572_s29 = sshll.u32 %s187_s28, 7  ;;  %s840_s26 = sshll.u32 %s916_s15, 4  ;;  %s841_s26 = int_to_ptr.vmem [resolvable:$false] %s840_s26 }
  0x19   : > { %s1002_s5 = scalar_lea.vmem %s1126_s0, %s572_s29  ;;  %s842_s27 = scalar_lea.vmem %s841_s26, 512 }
  0x1a   : > { %v194_v1 = vld [vmem:[%s1002_s5] sm:$0xff]  ;;  %v195_v2 = vld [vmem:[%s1002_s5 + $0x8] sm:$0xff]  ;;  %v196_v3 = vld [vmem:[%s1002_s5 + $0x10] sm:$0xff]  ;;  %p843_p1 = scmp.lt.s32.totalorder %s1073_s9, %s841_s26  ;;  %p844_p2 = scmp.lt.s32.totalorder %s842_s27, %s836_s23 }
  0x1b   : > { %v715_v4 = vpack.c.bf16 %v195_v2, %v194_v1  ;;  %v197_v5 = vld [vmem:[%s1002_s5 + $0x18] sm:$0xff]  ;;  %v198_v7 = vld [vmem:[%s1002_s5 + $0x20] sm:$0xff]  ;;  %v199_v8 = vld [vmem:[%s1002_s5 + $0x28] sm:$0xff] }
  0x1c   : > { %v719_v6 = vpack.c.bf16 %v197_v5, %v196_v3  ;;  %v723_v9 = vpack.c.bf16 %v199_v8, %v198_v7  ;;  %v200_v10 = vld [vmem:[%s1002_s5 + $0x30] sm:$0xff]  ;;  %v201_v11 = vld [vmem:[%s1002_s5 + $0x38] sm:$0xff]  ;;  %v202_v13 = vld [vmem:[%s1002_s5 + $0x40] sm:$0xff]  ;;  %p845_p3 = por %p844_p2, %p843_p1 }
  0x1d   : > { %716 = vmatprep.subr.bf16.mxu0 %v715_v4  ;;  %v727_v12 = vpack.c.bf16 %v201_v11, %v200_v10  ;;  %v203_v14 = vld [vmem:[%s1002_s5 + $0x48] sm:$0xff]  ;;  %v204_v16 = vld [vmem:[%s1002_s5 + $0x50] sm:$0xff]  ;;  %v205_v17 = vld [vmem:[%s1002_s5 + $0x58] sm:$0xff] }
  0x1e   : > { %718 = vmatpush3.bf16.msra.mxu0 %v715_v4  ;;  %v731_v15 = vpack.c.bf16 %v203_v14, %v202_v13  ;;  %v735_v18 = vpack.c.bf16 %v205_v17, %v204_v16  ;;  %v206_v19 = vld [vmem:[%s1002_s5 + $0x60] sm:$0xff]  ;;  %v207_v20 = vld [vmem:[%s1002_s5 + $0x68] sm:$0xff]  ;;  %v208_v22 = vld [vmem:[%s1002_s5 + $0x70] sm:$0xff]  ;;  %p846_p5 = pnand %p845_p3, %p839_p0 }
  0x1f   : > { %720 = vmatprep.subr.bf16.mxu0 %v719_v6  ;;  %v739_v21 = vpack.c.bf16 %v207_v20, %v206_v19  ;;  %v209_v23 = vld [vmem:[%s1002_s5 + $0x78] sm:$0xff]  ;;  %v388_v17 = vld [vmem:[%s1128_s2 + $0x8] sm:$0xff] }
  0x20   : > { %v743_v24 = vpack.c.bf16 %v209_v23, %v208_v22 }
  0x22   : > { %722 = vmatpush3.bf16.msra.mxu0 %v719_v6 }
  0x23   : > { %724 = vmatprep.subr.bf16.mxu0 %v723_v9 }
  0x26   : > { %726 = vmatpush3.bf16.msra.mxu0 %v723_v9 }
  0x27   : > { %728 = vmatprep.subr.bf16.mxu0 %v727_v12 }
  0x2a   : > { %730 = vmatpush3.bf16.msra.mxu0 %v727_v12 }
  0x2b   : > { %732 = vmatprep.subr.bf16.mxu0 %v731_v15 }
  0x2e   : > { %734 = vmatpush3.bf16.msra.mxu0 %v731_v15 }
  0x2f   : > { %736 = vmatprep.subr.bf16.mxu0 %v735_v18 }
  0x32   : > { %738 = vmatpush3.bf16.msra.mxu0 %v735_v18 }
  0x33   : > { %740 = vmatprep.subr.bf16.mxu0 %v739_v21 }
  0x36   : > { %742 = vmatpush3.bf16.msra.mxu0 %v739_v21 }
  0x37   : > { %744 = vmatprep.subr.bf16.mxu0 %v743_v24 }
  0x3a   : > { %746 = vmatpush3.bf16.msra.mxu0 %v743_v24 }
  0x3d   : > { %657 = vmatmul.mubr.f32.vlgmr.msra.gmra.mrb[0].mxu0 %v211_v25 }
  0x3e   : > { %659 = vmatprep.mubr.f32.mxu0 %v212_v26 }
  0x41   : > { %660 = vmatmul.mubr.f32.gmra.mrb[2].mxu0 %v213_v27 }
  0x42   : > { %662 = vmatprep.mubr.f32.mxu0 %v214_v28 }
  0x45   : > { %663 = vmatmul.mubr.f32.gmra.mrb[4].mxu0 %v215_v29 }
  0x46   : > { %665 = vmatprep.mubr.f32.mxu0 %v216_v30 }
  0x49   : > { %666 = vmatmul.mubr.f32.gmra.mrb[6].mxu0 %v217_v31 }
  0x4a   : > { %668 = vmatprep.mubr.f32.mxu0 %v218_v32 }
  0x4d   : > { %669 = vmatmul.mubr.f32.gmra.mrb[8].mxu0 %v219_v33 }
  0x4e   : > { %671 = vmatprep.mubr.f32.mxu0 %v220_v34 }
  0x51   : > { %672 = vmatmul.mubr.f32.gmra.mrb[10].mxu0 %v221_v35 }
  0x52   : > { %674 = vmatprep.mubr.f32.mxu0 %v222_v36 }
  0x55   : > { %675 = vmatmul.mubr.f32.gmra.mrb[12].mxu0 %v223_v37 }
  0x56   : > { %677 = vmatprep.mubr.f32.mxu0 %v224_v38 }
  0x59   : > { %678 = vmatmul.mubr.f32.gmra.mrb[14].mxu0 %v225_v39 }
 0x110   : > { %v658_v41 = vpop.f32.mrb[0].mxu0 }
 0x111   : > { %v372_v42 = vmul.f32 %v658_v41, %v658_v41  ;;  %v292_v43 = vpop.f32.mrb[1].mxu0 }
 0x112   : > { %v371_v44 = vmul.f32 %v292_v43, %v292_v43 }
 0x114   : > { %v661_v45 = vpop.f32.mrb[2].mxu0  ;;  %v747_v46 = vpack.c.bf16 %v372_v42, %v371_v44 }
 0x115   : > { %v374_v47 = vmul.f32 %v661_v45, %v661_v45  ;;  %v302_v48 = vpop.f32.mrb[3].mxu0 }
 0x116   : > { %v373_v49 = vmul.f32 %v302_v48, %v302_v48  ;;  %748 = vmatprep.subr.bf16.mxu1 %v747_v46 }
 0x117   : > { %750 = vmatpush3.bf16.msra.mxu1 %v747_v46 }
 0x118   : > { %v751_v50 = vpack.c.bf16 %v374_v47, %v373_v49  ;;  %v664_v51 = vpop.f32.mrb[4].mxu0 }
 0x119   : > { %v376_v52 = vmul.f32 %v664_v51, %v664_v51  ;;  %v312_v53 = vpop.f32.mrb[5].mxu0 }
 0x11a   : > { %v375_v54 = vmul.f32 %v312_v53, %v312_v53  ;;  %752 = vmatprep.subr.bf16.mxu1 %v751_v50 }
 0x11b   : > { %754 = vmatpush3.bf16.msra.mxu1 %v751_v50 }
 0x11c   : > { %v755_v55 = vpack.c.bf16 %v376_v52, %v375_v54  ;;  %v667_v56 = vpop.f32.mrb[6].mxu0 }
 0x11d   : > { %v378_v57 = vmul.f32 %v667_v56, %v667_v56  ;;  %v322_v58 = vpop.f32.mrb[7].mxu0 }
 0x11e   : > { %v377_v59 = vmul.f32 %v322_v58, %v322_v58  ;;  %756 = vmatprep.subr.bf16.mxu1 %v755_v55 }
 0x11f   : > { %758 = vmatpush3.bf16.msra.mxu1 %v755_v55 }
 0x120   : > { %v759_v60 = vpack.c.bf16 %v378_v57, %v377_v59  ;;  %v670_v61 = vpop.f32.mrb[8].mxu0 }
 0x121   : > { %v380_v62 = vmul.f32 %v670_v61, %v670_v61  ;;  %v332_v63 = vpop.f32.mrb[9].mxu0 }
 0x122   : > { %v379_v0 = vmul.f32 %v332_v63, %v332_v63  ;;  %760 = vmatprep.subr.bf16.mxu1 %v759_v60 }
 0x123   : > { %762 = vmatpush3.bf16.msra.mxu1 %v759_v60 }
 0x124   : > { %v763_v1 = vpack.c.bf16 %v380_v62, %v379_v0  ;;  %v673_v2 = vpop.f32.mrb[10].mxu0 }
 0x125   : > { %v382_v3 = vmul.f32 %v673_v2, %v673_v2  ;;  %v342_v4 = vpop.f32.mrb[11].mxu0 }
 0x126   : > { %v381_v5 = vmul.f32 %v342_v4, %v342_v4  ;;  %764 = vmatprep.subr.bf16.mxu1 %v763_v1 }
 0x127   : > { %766 = vmatpush3.bf16.msra.mxu1 %v763_v1 }
 0x128   : > { %v767_v6 = vpack.c.bf16 %v382_v3, %v381_v5  ;;  %v676_v7 = vpop.f32.mrb[12].mxu0 }
 0x129   : > { %v384_v8 = vmul.f32 %v676_v7, %v676_v7  ;;  %v352_v9 = vpop.f32.mrb[13].mxu0 }
 0x12a   : > { %v383_v10 = vmul.f32 %v352_v9, %v352_v9  ;;  %768 = vmatprep.subr.bf16.mxu1 %v767_v6 }
 0x12b   : > { %770 = vmatpush3.bf16.msra.mxu1 %v767_v6 }
 0x12c   : > { %v771_v11 = vpack.c.bf16 %v384_v8, %v383_v10  ;;  %v679_v12 = vpop.f32.mrb[14].mxu0 }
 0x12d   : > { %v386_v13 = vmul.f32 %v679_v12, %v679_v12  ;;  %v362_v14 = vpop.f32.mrb[15].mxu0 }
 0x12e   : > { %v385_v15 = vmul.f32 %v362_v14, %v362_v14  ;;  %772 = vmatprep.subr.bf16.mxu1 %v771_v11 }
 0x12f   : > { %774 = vmatpush3.bf16.msra.mxu1 %v771_v11 }
 0x130   : > { %v775_v16 = vpack.c.bf16 %v386_v13, %v385_v15 }
 0x132   : > { %776 = vmatprep.subr.bf16.mxu1 %v775_v16 }
 0x133   : > { %778 = vmatpush3.bf16.msra.mxu1 %v775_v16 }
 0x136   : > { %713 = vmatmul.mubr.f32.vlgmr.msra.gmra.mrb[0].mxu1 %v388_v17 }
 0x209   : > { %v714_v18 = vpop.f32.mrb[0].mxu1 }
 0x20a   : > { %465 = vst [vmem:[%s185_s8 + $0x8] sm:$0xff] %v714_v18  ;;  %v455_v19 = vpop.f32.mrb[1].mxu1 }
 0x20b   : > { %464 = vst [vmem:[%s185_s8] sm:$0xff] %v455_v19 }
 0x20c   : > { %849 = shalt.err (!%p846_p5)
}
 0x20d   : > { %s850_s28 = scalar_lea.hbm %s1078_s19, 256  ;;  %s854_s4 = scalar_lea.hbm %s1129_s3, 512 }
 0x20e   : > { %p851_p6 = scmp.ne.s32.totalorder %s1078_s19, %s850_s28  ;;  %p855_p10 = scmp.lt.u32.totalorder %s1078_s19, %s1129_s3 }
 0x20f   : > { %p856_p11 = scmp.lt.u32.totalorder %s854_s4, %s850_s28  ;;  %p858_p13 = scmp.lt.u32.totalorder %s850_s28, %s1078_s19 }
 0x210   : > { %p852_p7 = pnand %p851_p6, %p979_p4 }
 0x211   : > { %p857_p12 = por %p856_p11, %p855_p10 }
 0x212   : > { %p853_p9 = pneg %p852_p7 }
 0x213   : > { %p859_p0 = por %p858_p13, %p857_p12 }
 0x215   : > { %p860_p1 = pnand %p859_p0, %p853_p9 }
 0x217   : > { %863 = shalt.err (!%p860_p1)
}
 0x218   : > { %s917_s7 = smov 128   ;;  %s918_s8 = smov 8  }
 0x219   : > { %779 = dma.vmem_to_hbm [thread:$0]  (%p979_p4), %s1073_s9, 256, %s1078_s19, %s1080_s21, %s917_s7, %s917_s7, %s918_s8  }
 0x21a PF: > { %p785_p2 = scmp.ge.s32.totalorder %s914_s17, 2  ;;  %s496_s10 = sand.u32 1, %s894_s12  }
 0x21b   : > { %s497_s11 = scalar_lea.sflag [#allocation3], %s496_s10 }
 0x21c   : > { %p782_p3 = pnand %p785_p2, %p986_p8 }
 0x21e   : > { %889 = dma.done.wait (!%p782_p3), %s497_s11, 256  }
 0x21f   : > { %891 = vsyncadd (!%p782_p3), %s497_s11, 4294967040  ;;  %s16_s17 = sadd.s32 1, %s914_s17   ;;  %s1132_s12 = smov %s898_s13 }
 0x220   : > { %p13_p5 = scmp.ge.s32.totalorder %s16_s17, 4   ;;  %s1133_s13 = smov %s902_s14 }
 0x221   : > { %s1134_s14 = smov %s992_s25  ;;  %s1135_s15 = smov %s910_s16 }
 0x222   : > { %s1136_s16 = smov %s1138_s20  ;;  %15 = sbr.rel (!%p13_p5) target bundleno = 4 (0x4), region = 67 }
 0x229   :  { %502 = vsyncpa [#allocation3], 1 }
 0x22a   :  { %504 = vsyncpa [#allocation3 + $0x1], 1 }

</bundles_post_ra>
